<compile_context>
chip_gen: v6e
topology: v6e:2x2x1
jax: 0.10.0
libtpu: 0.0.40
codegen_flags: <defaults>
</compile_context>

<pallas_src>
import functools

import jax
import jax.numpy as jnp
from jax import lax
from jax.experimental import pallas as pl
from jax.experimental.pallas import tpu as pltpu


def _gcn_kernel(*refs, normalization: str, fuse_weight: bool,
                feats_resident: bool, tk: int):
    """One (row-tile i, contraction-tile k) grid step.

    refs (in order, presence depends on flags):
      d_row_ref : [tm, 1]        f32   (only 'sym') output-row scale deg^-1/2
      feat_ref  : [tk|Np, Fp]    bf16  pre-scaled features (or X@W^T)
      adj_ref   : [tm, tk]       bf16  adjacency tile
      wT_ref    : [Fp, Fo]       bf16  (only when fuse_weight)
      out_ref   : [tm, Fo|Fp]
      acc_ref   : [tm, Fp]       f32   VMEM accumulator for A @ feats
      deg_ref   : [tm, 1]        f32   (only 'rw') in-kernel row degree
    """
    it = iter(refs)
    d_row_ref = next(it) if normalization == "sym" else None
    feat_ref = next(it)
    adj_ref = next(it)
    wT_ref = next(it) if fuse_weight else None
    out_ref = next(it)
    acc_ref = next(it)
    deg_ref = next(it) if normalization == "rw" else None

    k = pl.program_id(1)

    @pl.when(k == 0)
    def _():
        acc_ref[...] = jnp.zeros_like(acc_ref)
        if deg_ref is not None:
            deg_ref[...] = jnp.zeros_like(deg_ref)

    adj = adj_ref[...]                                      # bf16 [tm, tk]
    if feats_resident:
        start = pl.multiple_of(k * tk, 128)
        feats = feat_ref[pl.ds(start, tk), :]               # bf16 [tk, Fp]
    else:
        feats = feat_ref[...]                               # bf16 [tk, Fp]

    # bf16 MXU inputs, f32 accumulation.
    acc_ref[...] += jnp.dot(adj, feats, preferred_element_type=jnp.float32)

    if deg_ref is not None:                                 # 'rw': degree in-kernel
        deg_ref[...] += jnp.sum(adj.astype(jnp.float32), axis=1, keepdims=True)

    @pl.when(k == pl.num_programs(1) - 1)
    def _():
        if normalization == "sym":
            d_row = d_row_ref[...]
        else:
            deg = deg_ref[...]
            d_row = jnp.where(deg > 0.0, 1.0 / deg, 0.0)
        h = acc_ref[...] * d_row                            # fold row normalization
        if fuse_weight:
            y = jnp.dot(h.astype(jnp.bfloat16), wT_ref[...],
                        preferred_element_type=jnp.float32)
        else:
            y = h
        out_ref[...] = y.astype(out_ref.dtype)


def _round_up(x: int, m: int) -> int:
    return -(-x // m) * m


def _pick_tile(n: int, target: int, align: int) -> int:
    """Tile size <= ~target (aligned) that minimizes padding of n."""
    if n <= target:
        return _round_up(n, align)
    ntiles = -(-n // target)
    return _round_up(-(-n // ntiles), align)


def _maybe_pad(a, pads):
    if all(lo == 0 and hi == 0 for lo, hi in pads):
        return a
    return jnp.pad(a, pads)


@functools.partial(jax.jit, static_argnames=("normalization",))
def gcn_layer_forward(adj, features, weight, normalization: str = "sym"):
    """adj: [N, N] dense float adjacency; features: [N, F_in];
    weight: [F_out, F_in] (PyTorch nn.Linear layout). Returns [N, F_out]."""
    if normalization not in ("sym", "rw"):
        raise ValueError("Invalid normalization type. Choose 'sym' or 'rw'.")

    n, f_in = features.shape
    f_out = weight.shape[0]
    out_dtype = features.dtype

    x = features.astype(jnp.float32)
    w = weight.astype(jnp.float32)

    # ---- normalization scales (only what cannot be done in-kernel) ----------
    if normalization == "sym":
        deg = jnp.sum(adj.astype(jnp.float32), axis=1, keepdims=True)   # [N,1]
        d = jnp.where(deg > 0.0, lax.rsqrt(deg), 0.0)
        d_row = d                       # output-row scale, used in the epilogue
        x_scaled = x * d                # D^{-1/2} (columns) folded into X once
    else:                               # 'rw': degree accumulated inside kernel
        d_row = None
        x_scaled = x

    # ---- where the weight matmul happens -------------------------------------
    f_in_pad = _round_up(f_in, 128)
    f_out_pad = _round_up(f_out, 128)
    if f_out < f_in:
        weight_mode = "pre"             # X@W^T first: adj contracts over F_out
    elif f_in_pad * f_out_pad * 2 <= 8 * 1024 * 1024:
        weight_mode = "fused"           # small bf16 W^T stays VMEM-resident
    else:
        weight_mode = "post"            # huge W^T: keep it out of VMEM (v7x 64 MiB)

    if weight_mode == "pre":
        feats = x_scaled @ w.T          # [N, F_out] (tiny vs the N^2 matmul)
        f_feat = f_out
    else:
        feats = x_scaled                # [N, F_in]
        f_feat = f_in
    f_feat_pad = _round_up(f_feat, 128)

    # ---- tiles: clamp to the graph for small N, grow for large N -------------
    tm = _pick_tile(n, 512 if n > 2048 else 256, 16)   # bf16 sublane multiple
    tk = _pick_tile(n, 1024, 128)                      # lane multiple
    n_pad_r = _round_up(n, tm)
    n_pad_c = _round_up(n, tk)

    # bf16 cast fused into the padded copy (halves the HBM write of the copy).
    adj_p = _maybe_pad(adj.astype(jnp.bfloat16),
                       ((0, n_pad_r - n), (0, n_pad_c - n)))
    feats_p = _maybe_pad(feats.astype(jnp.bfloat16),
                         ((0, n_pad_c - n), (0, f_feat_pad - f_feat)))

    # Keep the whole bf16 feature matrix VMEM-resident when it fits: one DMA
    # total instead of one re-stream per row tile.
    feats_resident = n_pad_c * f_feat_pad * 2 <= 12 * 1024 * 1024

    in_specs = []
    args = []
    if normalization == "sym":
        d_row_p = _maybe_pad(d_row, ((0, n_pad_r - n), (0, 0)))
        in_specs.append(pl.BlockSpec((tm, 1), lambda i, k: (i, 0)))
        args.append(d_row_p)
    if feats_resident:
        in_specs.append(pl.BlockSpec((n_pad_c, f_feat_pad), lambda i, k: (0, 0)))
    else:
        in_specs.append(pl.BlockSpec((tk, f_feat_pad), lambda i, k: (k, 0)))
    args.append(feats_p)
    in_specs.append(pl.BlockSpec((tm, tk), lambda i, k: (i, k)))   # adjacency
    args.append(adj_p)

    fuse_weight = weight_mode == "fused"
    if fuse_weight:
        wT_p = _maybe_pad(w.T.astype(jnp.bfloat16),
                          ((0, f_feat_pad - f_in), (0, f_out_pad - f_out)))
        in_specs.append(pl.BlockSpec((f_feat_pad, f_out_pad), lambda i, k: (0, 0)))
        args.append(wT_p)

    out_w = f_out_pad if fuse_weight else f_feat_pad        # lane-dense store

    scratch_shapes = [pltpu.VMEM((tm, f_feat_pad), jnp.float32)]
    if normalization == "rw":
        scratch_shapes.append(pltpu.VMEM((tm, 1), jnp.float32))

    # Conservative VMEM estimate (2 pipeline buffers everywhere) so the scoped
    # limit can be raised explicitly (v5e's default is only 16 MiB).
    out_isize = jnp.dtype(out_dtype).itemsize
    vmem_est = (2 * tm * tk * 2
                + 2 * (n_pad_c if feats_resident else tk) * f_feat_pad * 2
                + 2 * tm * out_w * out_isize
                + tm * f_feat_pad * 4
                + 4 * tm * 4)
    if fuse_weight:
        vmem_est += 2 * f_feat_pad * f_out_pad * 2
    vmem_limit = int(min(max(vmem_est + (4 << 20), 32 << 20), 64 << 20))

    kernel = functools.partial(_gcn_kernel,
                               normalization=normalization,
                               fuse_weight=fuse_weight,
                               feats_resident=feats_resident,
                               tk=tk)

    out_p = pl.pallas_call(
        kernel,
        out_shape=jax.ShapeDtypeStruct((n_pad_r, out_w), out_dtype),
        grid=(n_pad_r // tm, n_pad_c // tk),
        in_specs=in_specs,
        out_specs=pl.BlockSpec((tm, out_w), lambda i, k: (i, 0)),
        scratch_shapes=scratch_shapes,
        compiler_params=pltpu.CompilerParams(
            dimension_semantics=("parallel", "arbitrary"),
            vmem_limit_bytes=vmem_limit),
    )(*args)

    if weight_mode == "post":
        return (out_p[:n, :f_in] @ w.T).astype(out_dtype)
    return out_p[:n, :f_out]


def _reference(adj, features, weight, normalization="sym"):
    adj = adj.astype(jnp.float32)
    deg = jnp.sum(adj, axis=1)
    if normalization == "sym":
        d = jnp.where(deg > 0, deg ** -0.5, 0.0)
        adj_n = d[:, None] * adj * d[None, :]
    else:
        d = jnp.where(deg > 0, 1.0 / deg, 0.0)
        adj_n = d[:, None] * adj
    return (adj_n @ features.astype(jnp.float32)) @ weight.T.astype(jnp.float32)


def _make_graph(key, num_nodes):
    dense_rand = jax.random.uniform(key, (num_nodes, num_nodes), dtype=jnp.float32)
    adj = jnp.where(dense_rand > 0.8, dense_rand, 0.0)
    return adj.at[3, :].set(0.0)        # isolated node -> exercises deg==0 path


if __name__ == "__main__":
    num_nodes, input_dim, output_dim = 64, 16, 32

    key = jax.random.PRNGKey(0)
    k_adj, k_feat, k_w, k_w2, k_adj2, k_feat2 = jax.random.split(key, 6)

    adj = _make_graph(k_adj, num_nodes)
    features = jax.random.normal(k_feat, (num_nodes, input_dim), dtype=jnp.float32)

    # nn.Linear(input_dim, output_dim, bias=False): weight shape [output_dim, input_dim].
    bound = 1.0 / (input_dim ** 0.5)
    weight = jax.random.uniform(k_w, (output_dim, input_dim), dtype=jnp.float32,
                                minval=-bound, maxval=bound)
    # A second head with F_out < F_in to exercise the 'pre' weight-ordering path.
    weight_small = jax.random.uniform(k_w2, (8, input_dim), dtype=jnp.float32,
                                      minval=-bound, maxval=bound)

    out_sym = jax.block_until_ready(
        gcn_layer_forward(adj, features, weight, normalization="sym"))
    out_rw = jax.block_until_ready(
        gcn_layer_forward(adj, features, weight, normalization="rw"))
    out_small = jax.block_until_ready(
        gcn_layer_forward(adj, features, weight_small, normalization="sym"))

    assert out_sym.shape == (num_nodes, output_dim)
    assert out_small.shape == (num_nodes, 8)
    # bf16 MXU inputs (f32 accumulation) -> slightly looser tolerance than pure f32.
    assert jnp.allclose(out_sym, _reference(adj, features, weight, "sym"),
                        atol=2e-2, rtol=2e-2)
    assert jnp.allclose(out_rw, _reference(adj, features, weight, "rw"),
                        atol=2e-2, rtol=2e-2)
    assert jnp.allclose(out_small, _reference(adj, features, weight_small, "sym"),
                        atol=2e-2, rtol=2e-2)

    # Medium graph: exercises multi-row-tile / multi-k-tile grids, the in-kernel
    # 'rw' degree accumulation, and the VMEM-resident feature slicing path.
    n2 = 1100
    adj2 = _make_graph(k_adj2, n2)
    feats2 = jax.random.normal(k_feat2, (n2, input_dim), dtype=jnp.float32)
    out2_sym = jax.block_until_ready(
        gcn_layer_forward(adj2, feats2, weight, normalization="sym"))
    out2_rw = jax.block_until_ready(
        gcn_layer_forward(adj2, feats2, weight, normalization="rw"))
    assert out2_sym.shape == (n2, output_dim)
    assert jnp.allclose(out2_sym, _reference(adj2, feats2, weight, "sym"),
                        atol=2e-2, rtol=2e-2)
    assert jnp.allclose(out2_rw, _reference(adj2, feats2, weight, "rw"),
                        atol=2e-2, rtol=2e-2)

    print("KERNEL_OK")
</pallas_src>

<mosaic_0001>
module attributes {stable_mosaic.version = 11 : i64} {
  func.func @_gcn_kernel(%arg0: i32, %arg1: i32, %arg2: memref<64x1xf32, #tpu.memory_space<vmem>>, %arg3: memref<128x128xbf16, #tpu.memory_space<vmem>>, %arg4: memref<64x128xbf16, #tpu.memory_space<vmem>>, %arg5: memref<128x128xbf16, #tpu.memory_space<vmem>>, %arg6: memref<64x128xf32, #tpu.memory_space<vmem>>, %arg7: memref<64x128xf32, #tpu.memory_space<vmem>>) attributes {dimension_semantics = [#tpu.dimension_semantics<parallel>, #tpu.dimension_semantics<arbitrary>], iteration_bounds = array<i64: 1, 1>, scalar_prefetch = 0 : i64, scratch_operands = 1 : i64, tpu.core_type = #tpu.core_type<tc>, window_params = [{transform_indices = @transform_0, window_bounds = array<i64: 64, 1>}, {pipeline_mode = #tpu.pipeline_mode<synchronous>, transform_indices = @transform_1, window_bounds = array<i64: 128, 128>}, {transform_indices = @transform_2, window_bounds = array<i64: 64, 128>}, {pipeline_mode = #tpu.pipeline_mode<synchronous>, transform_indices = @transform_3, window_bounds = array<i64: 128, 128>}, {transform_indices = @transform_4, window_bounds = array<i64: 64, 128>}]} {
    %c0_i32 = arith.constant 0 : i32
    %0 = arith.cmpi eq, %arg1, %c0_i32 : i32
    %1 = arith.extui %0 : i1 to i32
    %c0_i32_0 = arith.constant 0 : i32
    %2 = arith.cmpi ne, %1, %c0_i32_0 : i32
    scf.if %2 {
      %cst_9 = arith.constant 0.000000e+00 : f32
      %15 = vector.broadcast %cst_9 : f32 to vector<64x128xf32>
      %c0_10 = arith.constant 0 : index
      %c0_11 = arith.constant 0 : index
      %16 = vector.load %arg7[%c0_10, %c0_11] : memref<64x128xf32, #tpu.memory_space<vmem>>, vector<64x128xf32>
      tpu.vector_store %arg7[%c0_10, %c0_11], %15 {strides = array<i32>} : memref<64x128xf32, #tpu.memory_space<vmem>>, vector<64x128xf32>,
    } else {
    }
    %c0 = arith.constant 0 : index
    %c0_1 = arith.constant 0 : index
    %3 = vector.load %arg4[%c0, %c0_1] : memref<64x128xbf16, #tpu.memory_space<vmem>>, vector<64x128xbf16>
    %c128_i32 = arith.constant 128 : i32
    %4 = arith.muli %arg1, %c128_i32 : i32
    %5 = tpu.assume_multiple %4, 128 : i32
    %6 = arith.index_cast %5 : i32 to index
    %c0_2 = arith.constant 0 : index
    %7 = vector.load %arg3[%6, %c0_2] : memref<128x128xbf16, #tpu.memory_space<vmem>>, vector<128x128xbf16>
    %c0_3 = arith.constant 0 : index
    %c0_4 = arith.constant 0 : index
    %8 = vector.load %arg7[%c0_3, %c0_4] : memref<64x128xf32, #tpu.memory_space<vmem>>, vector<64x128xf32>
    %cst = arith.constant dense<0.000000e+00> : vector<64x128xf32>
    %9 = tpu.matmul %3, %7, %cst {dimension_numbers = #tpu.dot_dimension_numbers<[1], [0], [0], [1], [0, 0, 1, 1], [], []>} : vector<64x128xbf16>, vector<128x128xbf16>, vector<64x128xf32> -> vector<64x128xf32>
    %10 = arith.addf %8, %9 : vector<64x128xf32>
    %c0_5 = arith.constant 0 : index
    %c0_6 = arith.constant 0 : index
    %11 = vector.load %arg7[%c0_5, %c0_6] : memref<64x128xf32, #tpu.memory_space<vmem>>, vector<64x128xf32>
    tpu.vector_store %arg7[%c0_5, %c0_6], %10 {strides = array<i32>} : memref<64x128xf32, #tpu.memory_space<vmem>>, vector<64x128xf32>,
    %c0_i32_7 = arith.constant 0 : i32
    %12 = arith.cmpi eq, %arg1, %c0_i32_7 : i32
    %13 = arith.extui %12 : i1 to i32
    %c0_i32_8 = arith.constant 0 : i32
    %14 = arith.cmpi ne, %13, %c0_i32_8 : i32
    scf.if %14 {
      %c0_9 = arith.constant 0 : index
      %c0_10 = arith.constant 0 : index
      %15 = vector.load %arg2[%c0_9, %c0_10] : memref<64x1xf32, #tpu.memory_space<vmem>>, vector<64x1xf32>
      %c0_11 = arith.constant 0 : index
      %c0_12 = arith.constant 0 : index
      %16 = vector.load %arg7[%c0_11, %c0_12] : memref<64x128xf32, #tpu.memory_space<vmem>>, vector<64x128xf32>
      %17 = vector.broadcast %15 : vector<64x1xf32> to vector<64x128xf32>
      %18 = arith.mulf %16, %17 : vector<64x128xf32>
      %19 = arith.truncf %18 : vector<64x128xf32> to vector<64x128xbf16>
      %c0_13 = arith.constant 0 : index
      %c0_14 = arith.constant 0 : index
      %20 = vector.load %arg5[%c0_13, %c0_14] : memref<128x128xbf16, #tpu.memory_space<vmem>>, vector<128x128xbf16>
      %cst_15 = arith.constant dense<0.000000e+00> : vector<64x128xf32>
      %21 = tpu.matmul %19, %20, %cst_15 {dimension_numbers = #tpu.dot_dimension_numbers<[1], [0], [0], [1], [0, 0, 1, 1], [], []>} : vector<64x128xbf16>, vector<128x128xbf16>, vector<64x128xf32> -> vector<64x128xf32>
      %c0_16 = arith.constant 0 : index
      %c0_17 = arith.constant 0 : index
      %22 = vector.load %arg6[%c0_16, %c0_17] : memref<64x128xf32, #tpu.memory_space<vmem>>, vector<64x128xf32>
      tpu.vector_store %arg6[%c0_16, %c0_17], %21 {strides = array<i32>} : memref<64x128xf32, #tpu.memory_space<vmem>>, vector<64x128xf32>,
    } else {
    }
    return
  }
  func.func @transform_0(%arg0: i32, %arg1: i32) -> (i32, i32) {
    %c0_i32 = arith.constant 0 : i32
    %c0_i32_0 = arith.constant 0 : i32
    return %arg0, %c0_i32 : i32, i32
  }
  func.func @transform_1(%arg0: i32, %arg1: i32) -> (i32, i32) {
    %c0_i32 = arith.constant 0 : i32
    %c0_i32_0 = arith.constant 0 : i32
    %c0_i32_1 = arith.constant 0 : i32
    return %c0_i32, %c0_i32_0 : i32, i32
  }
  func.func @transform_2(%arg0: i32, %arg1: i32) -> (i32, i32) {
    %c0_i32 = arith.constant 0 : i32
    return %arg0, %arg1 : i32, i32
  }
  func.func @transform_3(%arg0: i32, %arg1: i32) -> (i32, i32) {
    %c0_i32 = arith.constant 0 : i32
    %c0_i32_0 = arith.constant 0 : i32
    %c0_i32_1 = arith.constant 0 : i32
    return %c0_i32, %c0_i32_0 : i32, i32
  }
  func.func @transform_4(%arg0: i32, %arg1: i32) -> (i32, i32) {
    %c0_i32 = arith.constant 0 : i32
    %c0_i32_0 = arith.constant 0 : i32
    return %arg0, %c0_i32 : i32, i32
  }
}

</mosaic_0001>

<bundles_post_ra>
// kernel: gcn_layer_forward.1
= control target key start
LH: loop header
LB: loop body
LE: loop exit
PB: predicated region body
PF: predicated region fallthrough
CT: control target
= control target key end

     0   :  { %v549_v1 = vmov 0   ;;  %s683_s1 = inlined_call_operand.vmem [shape: bf16[128,128], index: 1, kind: input, shape index: {}]   ;;  %s684_s2 = inlined_call_operand.vmem [shape: bf16[64,128], index: 2, kind: input, shape index: {}]   ;;  %s685_s0 = inlined_call_operand.vmem [shape: f32[64,1], index: 0, kind: input, shape index: {}]   ;;  %s686_s3 = inlined_call_operand.vmem [shape: bf16[128,128], index: 3, kind: input, shape index: {}]   ;;  %s687_s4 = inlined_call_operand.vmem [shape: f32[64,128], index: 4, kind: output, shape index: {}]  }
   0x1   :  { %v529_v0 = vld [vmem:[%s683_s1 + $0x38] sm:$0xff]   ;;  %527 = vset.pattern.permute.xlu0 %v549_v1  ;;  %528 = vset.pattern.permute.xlu1 %v549_v1  ;;  %v530_v2 = vld [vmem:[%s683_s1 + $0x30] sm:$0xff]   ;;  %v531_v3 = vld [vmem:[%s683_s1 + $0x28] sm:$0xff]  }
   0x2   :  { %478 = vmatprep.subr.bf16.mxu0 %v529_v0  ;;  %v532_v4 = vld [vmem:[%s683_s1 + $0x20] sm:$0xff]   ;;  %v533_v6 = vld [vmem:[%s683_s1 + $0x18] sm:$0xff]   ;;  %v225_v8 = vld [vmem:[%s685_s0 + $0x10] sm:$0xff] }
   0x3   :  { %479 = vmatpush3.bf16.msra.mxu0 %v529_v0  ;;  %v537_v5 = vld [vmem:[%s684_s2] sm:$0xff]   ;;  %251 = vperm.xlu1 %528, %v225_v8   ;;  %v534_v9 = vld [vmem:[%s683_s1 + $0x10] sm:$0xff]   ;;  %v224_v10 = vld [vmem:[%s685_s0 + $0x8] sm:$0xff] }
   0x4   :  { %480 = vmatprep.subr.bf16.mxu0 %v530_v2  ;;  %494 = vmatprep.mubr.bf16.mxu0 %v537_v5  ;;  %v223_v7 = vld [vmem:[%s685_s0] sm:$0xff]  ;;  %v226_v11 = vld [vmem:[%s685_s0 + $0x18] sm:$0xff]  ;;  %v542_v13 = vld [vmem:[%s686_s3 + $0x30] sm:$0xff]  }
   0x5   :  { %241 = vperm.xlu0 %527, %v223_v7   ;;  %v541_v12 = vld [vmem:[%s686_s3 + $0x38] sm:$0xff]   ;;  %v227_v14 = vld [vmem:[%s685_s0 + $0x20] sm:$0xff]  ;;  %v535_v15 = vld [vmem:[%s683_s1 + $0x8] sm:$0xff]  }
   0x6   :  { %v228_v16 = vld [vmem:[%s685_s0 + $0x28] sm:$0xff]  ;;  %502 = vmatprep.subr.bf16.mxu1 %v541_v12  ;;  %v229_v18 = vld [vmem:[%s685_s0 + $0x30] sm:$0xff]  ;;  %v230_v19 = vld [vmem:[%s685_s0 + $0x38] sm:$0xff] }
   0x7   :  { %481 = vmatpush3.bf16.msra.mxu0 %v530_v2  ;;  %256 = vperm.xlu1 %528, %v226_v11   ;;  %v543_v17 = vld [vmem:[%s686_s3 + $0x28] sm:$0xff]   ;;  %v536_v20 = vld [vmem:[%s683_s1] sm:$0xff]   ;;  %v545_v22 = vld [vmem:[%s686_s3 + $0x18] sm:$0xff]  }
   0x8   :  { %482 = vmatprep.subr.bf16.mxu0 %v531_v3  ;;  %503 = vmatpush3.bf16.msra.mxu1 %v541_v12  ;;  %v544_v21 = vld [vmem:[%s686_s3 + $0x20] sm:$0xff]   ;;  %v538_v23 = vld [vmem:[%s684_s2 + $0x8] sm:$0xff]   ;;  %v539_v24 = vld [vmem:[%s684_s2 + $0x10] sm:$0xff]  }
   0x9   :  { %246 = vperm.xlu0 %527, %v224_v10   ;;  %504 = vmatprep.subr.bf16.mxu1 %v542_v13  ;;  %v540_v25 = vld [vmem:[%s684_s2 + $0x18] sm:$0xff]   ;;  %v546_v26 = vld [vmem:[%s686_s3 + $0x10] sm:$0xff]   ;;  %v547_v27 = vld [vmem:[%s686_s3 + $0x8] sm:$0xff]  }
   0xa   :  { %v548_v28 = vld [vmem:[%s686_s3] sm:$0xff]  }
   0xb   :  { %483 = vmatpush3.bf16.msra.mxu0 %v531_v3  ;;  %266 = vperm.xlu1 %528, %v228_v16  }
   0xc   :  { %484 = vmatprep.subr.bf16.mxu0 %v532_v4  ;;  %505 = vmatpush3.bf16.msra.mxu1 %v542_v13 }
   0xd   :  { %261 = vperm.xlu0 %527, %v227_v14   ;;  %506 = vmatprep.subr.bf16.mxu1 %v543_v17 }
   0xf   :  { %485 = vmatpush3.bf16.msra.mxu0 %v532_v4  ;;  %276 = vperm.xlu1 %528, %v230_v19  }
  0x10   :  { %486 = vmatprep.subr.bf16.mxu0 %v533_v6  ;;  %507 = vmatpush3.bf16.msra.mxu1 %v543_v17 }
  0x11   :  { %271 = vperm.xlu0 %527, %v229_v18   ;;  %508 = vmatprep.subr.bf16.mxu1 %v544_v21 }
  0x13   :  { %487 = vmatpush3.bf16.msra.mxu0 %v533_v6 }
  0x14   :  { %488 = vmatprep.subr.bf16.mxu0 %v534_v9  ;;  %509 = vmatpush3.bf16.msra.mxu1 %v544_v21 }
  0x15   :  { %510 = vmatprep.subr.bf16.mxu1 %v545_v22 }
  0x17   :  { %489 = vmatpush3.bf16.msra.mxu0 %v534_v9 }
  0x18   :  { %490 = vmatprep.subr.bf16.mxu0 %v535_v15  ;;  %511 = vmatpush3.bf16.msra.mxu1 %v545_v22 }
  0x19   :  { %512 = vmatprep.subr.bf16.mxu1 %v546_v26 }
  0x1b   :  { %491 = vmatpush3.bf16.msra.mxu0 %v535_v15 }
  0x1c   :  { %492 = vmatprep.subr.bf16.mxu0 %v536_v20  ;;  %513 = vmatpush3.bf16.msra.mxu1 %v546_v26 }
  0x1d   :  { %514 = vmatprep.subr.bf16.mxu1 %v547_v27 }
  0x1f   :  { %493 = vmatpush3.bf16.msra.mxu0 %v536_v20 }
  0x20   :  { %515 = vmatpush3.bf16.msra.mxu1 %v547_v27 }
  0x21   :  { %516 = vmatprep.subr.bf16.mxu1 %v548_v28 }
  0x22   :  { %495 = vmatmul.mubr.bf16.vlgmr.msra.gmra.mxu0 %v538_v23 }
  0x23   :  { %498 = vmatprep.mubr.bf16.mxu0 %v539_v24 }
  0x24   :  { %517 = vmatpush3.bf16.msra.mxu1 %v548_v28 }
  0x2a   :  { %499 = vmatmul.mubr.bf16.gmra.mxu0 %v540_v25 }
  0x7e   :  { %v252_v29 = vpop.permute.xlu1 %251 }
  0x80   :  { %v242_v30 = vpop.permute.xlu0 %241 }
  0x82   :  { %v257_v32 = vpop.permute.xlu1 %256 }
  0x84   :  { %v247_v34 = vpop.permute.xlu0 %246 }
  0x86   :  { %v267_v38 = vpop.permute.xlu1 %266 }
  0x88   :  { %v262_v43 = vpop.permute.xlu0 %261 }
  0x8a   :  { %v277_v48 = vpop.permute.xlu1 %276 }
  0x8c   :  { %v272_v51 = vpop.permute.xlu0 %271 }
  0xe2   :  { %v496_v31 = vpop.f32.mrf.mxu0 }
  0xe3   :  { %v281_v41 = vmul.f32 %v496_v31, %v252_v29 }
  0xe4   :  { %v173_v33 = vpop.f32.mrf.mxu0 }
  0xe5   :  { %v279_v39 = vmul.f32 %v242_v30, %v173_v33 }
  0xe6   :  { %v497_v35 = vpop.f32.mrf.mxu0 }
  0xe7   :  { %v282_v36 = vmul.f32 %v497_v35, %v257_v32 }
  0xe8   :  { %v176_v37 = vpop.f32.mrf.mxu0 }
  0xe9   :  { %v280_v40 = vmul.f32 %v247_v34, %v176_v37  ;;  %v288_v45 = vpack.c.bf16 %v282_v36, %v281_v41 }
  0xea   :  { %v500_v42 = vpop.f32.mrf.mxu0 }
  0xeb   :  { %v287_v44 = vpack.c.bf16 %v280_v40, %v279_v39  ;;  %v285_v54 = vmul.f32 %v500_v42, %v272_v51 }
  0xec   :  { %v189_v46 = vpop.f32.mrf.mxu0 }
  0xed   :  { %518 = vmatprep.mubr.bf16.mxu1 %v287_v44  ;;  %v283_v52 = vmul.f32 %v262_v43, %v189_v46 }
  0xee   :  { %v501_v47 = vpop.f32.mrf.mxu0  ;;  %519 = vmatmul.mubr.bf16.vlgmr.msra.gmra.mxu1 %v288_v45 }
  0xef   :  { %v286_v49 = vmul.f32 %v501_v47, %v277_v48 }
  0xf0   :  { %v192_v50 = vpop.f32.mrf.mxu0 }
  0xf1   :  { %v284_v53 = vmul.f32 %v267_v38, %v192_v50  ;;  %v290_v56 = vpack.c.bf16 %v286_v49, %v285_v54 }
  0xf3   :  { %v289_v55 = vpack.c.bf16 %v284_v53, %v283_v52 }
  0xf5   :  { %522 = vmatprep.mubr.bf16.mxu1 %v289_v55 }
  0xf6   :  { %523 = vmatmul.mubr.bf16.gmra.mxu1 %v290_v56 }
 0x1ae   :  { %v520_v57 = vpop.f32.mrf.mxu1 }
 0x1af   :  { %422 = vst [vmem:[%s687_s4 + $0x10] sm:$0xff] %v520_v57 }
 0x1b0   :  { %v389_v58 = vpop.f32.mrf.mxu1 }
 0x1b1   :  { %420 = vst [vmem:[%s687_s4] sm:$0xff] %v389_v58 }
 0x1b2   :  { %v521_v59 = vpop.f32.mrf.mxu1 }
 0x1b3   :  { %423 = vst [vmem:[%s687_s4 + $0x18] sm:$0xff] %v521_v59 }
 0x1b4   :  { %v392_v60 = vpop.f32.mrf.mxu1 }
 0x1b5   :  { %421 = vst [vmem:[%s687_s4 + $0x8] sm:$0xff] %v392_v60 }
 0x1b6   :  { %v524_v61 = vpop.f32.mrf.mxu1 }
 0x1b7   :  { %426 = vst [vmem:[%s687_s4 + $0x30] sm:$0xff] %v524_v61 }
 0x1b8   :  { %v405_v62 = vpop.f32.mrf.mxu1 }
 0x1b9   :  { %424 = vst [vmem:[%s687_s4 + $0x20] sm:$0xff] %v405_v62 }
 0x1ba   :  { %v525_v63 = vpop.f32.mrf.mxu1 }
 0x1bb   :  { %427 = vst [vmem:[%s687_s4 + $0x38] sm:$0xff] %v525_v63 }
 0x1bc   :  { %v408_v0 = vpop.f32.mrf.mxu1 }
 0x1bd   :  { %425 = vst [vmem:[%s687_s4 + $0x28] sm:$0xff] %v408_v0 }

</bundles_post_ra>
